<compile_context>
chip_gen: v7x
topology: tpu7x:2x2x1
jax: 0.10.0
libtpu: 0.0.40
codegen_flags: <defaults>
</compile_context>

<pallas_src>
import functools
import jax
import jax.numpy as jnp
from jax.experimental import pallas as pl
from jax.experimental.pallas import tpu as pltpu

# ---- tiling constants -------------------------------------------------------
FUSED_LANES = 512                       # lane width for the small fused path
FUSED_MAX_BYTES = 4 * 1024 * 1024       # tensors <= 4 MiB -> fused single block

TILE_LANES = 1024                       # lane width for the tiled path
TILE_ROWS = 512                         # 512 x 1024 f32 = 2 MiB per block


# ---------------------------------------------------------------------------
# Fused kernel (small/medium weights): whole tensor resident in VMEM.
# ---------------------------------------------------------------------------
def _fused_quant_kernel(x_ref, o_ref, *, qmax):
    x = x_ref[...].astype(jnp.float32)
    max_val = jnp.max(jnp.abs(x)) + 1e-8
    scale = qmax / max_val
    inv_scale = max_val / qmax
    o_ref[...] = (jnp.round(x * scale) * inv_scale).astype(o_ref.dtype)


# ---------------------------------------------------------------------------
# Tiled pass 1: global abs-max via an element-wise VMEM accumulator.
# Only the last grid step does the cross-lane reduction (+ eps).
# ---------------------------------------------------------------------------
def _absmax_kernel(x_ref, m_ref, acc_ref):
    i = pl.program_id(0)
    a = jnp.abs(x_ref[...].astype(jnp.float32))

    @pl.when(i == 0)
    def _():
        acc_ref[...] = a

    @pl.when(i > 0)
    def _():
        acc_ref[...] = jnp.maximum(acc_ref[...], a)

    @pl.when(i == pl.num_programs(0) - 1)
    def _():
        m_ref[0, 0] = jnp.max(acc_ref[...]) + 1e-8


# ---------------------------------------------------------------------------
# Tiled pass 2: elementwise quantize / dequantize using the global max scalar.
# ---------------------------------------------------------------------------
def _quant_kernel(max_ref, x_ref, o_ref, *, qmax):
    m = max_ref[0, 0]
    scale = qmax / m
    inv_scale = m / qmax
    x = x_ref[...].astype(jnp.float32)
    o_ref[...] = (jnp.round(x * scale) * inv_scale).astype(o_ref.dtype)


def quant_weight_pallas(w, k_bits=8):
    """Quantize an arbitrary-shaped weight tensor (max-abs symmetric, STE round)."""
    qmax = float(2.0 ** (k_bits - 1) - 1.0)
    orig_shape = w.shape
    orig_dtype = w.dtype
    n = int(w.size)
    itemsize = jnp.dtype(orig_dtype).itemsize

    flat = jnp.ravel(w)  # view for contiguous inputs; no extra HBM pass

    # ---------------- fused path: whole (padded) tensor fits in VMEM ----------
    if n * itemsize <= FUSED_MAX_BYTES:
        lane = FUSED_LANES
        padded = -(-n // lane) * lane
        if padded != n:
            flat = jnp.pad(flat, (0, padded - n))
        x2d = flat.reshape(padded // lane, lane)

        q2d = pl.pallas_call(
            functools.partial(_fused_quant_kernel, qmax=qmax),
            out_shape=jax.ShapeDtypeStruct(x2d.shape, orig_dtype),
            grid=(1,),
            in_specs=[pl.BlockSpec(x2d.shape, lambda i: (0, 0))],
            out_specs=pl.BlockSpec(x2d.shape, lambda i: (0, 0)),
            compiler_params=pltpu.CompilerParams(vmem_limit_bytes=32 << 20),
        )(x2d)

        q = q2d.reshape(-1)
        if padded != n:
            q = q[:n]
        return q.reshape(orig_shape)

    # ---------------- tiled two-pass path for large tensors -------------------
    lane = TILE_LANES
    block_rows = TILE_ROWS
    tile_elems = block_rows * lane
    padded = -(-n // tile_elems) * tile_elems
    if padded != n:
        flat = jnp.pad(flat, (0, padded - n))
    rows = padded // lane
    x2d = flat.reshape(rows, lane)
    grid = (rows // block_rows,)

    # Pass 1: global abs-max (+ eps) -> (1,1) f32.
    max_val = pl.pallas_call(
        _absmax_kernel,
        out_shape=jax.ShapeDtypeStruct((1, 1), jnp.float32),
        grid=grid,
        in_specs=[pl.BlockSpec((block_rows, lane), lambda i: (i, 0))],
        out_specs=pl.BlockSpec((1, 1), lambda i: (0, 0)),
        scratch_shapes=[pltpu.VMEM((block_rows, lane), jnp.float32)],
        compiler_params=pltpu.CompilerParams(
            dimension_semantics=("arbitrary",),
            vmem_limit_bytes=32 << 20,
        ),
    )(x2d)

    # Pass 2: elementwise quantize-dequantize (parallel / megacore friendly).
    q2d = pl.pallas_call(
        functools.partial(_quant_kernel, qmax=qmax),
        out_shape=jax.ShapeDtypeStruct((rows, lane), orig_dtype),
        grid=grid,
        in_specs=[
            pl.BlockSpec((1, 1), lambda i: (0, 0), memory_space=pltpu.SMEM),
            pl.BlockSpec((block_rows, lane), lambda i: (i, 0)),
        ],
        out_specs=pl.BlockSpec((block_rows, lane), lambda i: (i, 0)),
        compiler_params=pltpu.CompilerParams(
            dimension_semantics=("parallel",),
            vmem_limit_bytes=32 << 20,
        ),
    )(max_val, x2d)

    q = q2d.reshape(-1)
    if padded != n:
        q = q[:n]
    return q.reshape(orig_shape)


def quant_weight_ref(w, k_bits=8):
    """Pure-JAX reference mirroring the PyTorch module."""
    qmax = 2.0 ** (k_bits - 1) - 1.0
    max_val = jnp.max(jnp.abs(w)) + 1e-8
    return jnp.round(w * qmax / max_val) * max_val / qmax


if __name__ == "__main__":
    key = jax.random.PRNGKey(0)
    k_small, k_large = jax.random.split(key)
    k_bits = 8

    # Small Conv2d-style OIHW weight -> fused single-block path.
    w_small = jax.random.normal(k_small, (32, 8, 3, 3), dtype=jnp.float32) * 0.1
    q_small = jax.block_until_ready(quant_weight_pallas(w_small, k_bits=k_bits))
    ref_small = quant_weight_ref(w_small, k_bits=k_bits)
    assert q_small.shape == w_small.shape and q_small.dtype == w_small.dtype
    assert jnp.allclose(q_small, ref_small, atol=1e-6, rtol=1e-6), "fused path mismatch"

    # Larger weight (~4.5 MiB) -> tiled two-pass path (exercises pad + tail slice).
    w_large = jax.random.normal(k_large, (256, 128, 6, 6), dtype=jnp.float32) * 0.05
    q_large = jax.block_until_ready(quant_weight_pallas(w_large, k_bits=k_bits))
    ref_large = quant_weight_ref(w_large, k_bits=k_bits)
    assert q_large.shape == w_large.shape and q_large.dtype == w_large.dtype
    assert jnp.allclose(q_large, ref_large, atol=1e-6, rtol=1e-6), "tiled path mismatch"

    print("KERNEL_OK")
</pallas_src>

<mosaic_0001>
module attributes {stable_mosaic.version = 11 : i64} {
  func.func @_fused_quant_kernel(%arg0: i32, %arg1: memref<5x512xf32, #tpu.memory_space<vmem>>, %arg2: memref<5x512xf32, #tpu.memory_space<vmem>>) attributes {dimension_semantics = [#tpu.dimension_semantics<arbitrary>], iteration_bounds = array<i64: 1>, scalar_prefetch = 0 : i64, scratch_operands = 0 : i64, tpu.core_type = #tpu.core_type<tc>, window_params = [{pipeline_mode = #tpu.pipeline_mode<synchronous>, transform_indices = @transform_0, window_bounds = array<i64: 5, 512>}, {pipeline_mode = #tpu.pipeline_mode<synchronous>, transform_indices = @transform_1, window_bounds = array<i64: 5, 512>}]} {
    %c0 = arith.constant 0 : index
    %c0_0 = arith.constant 0 : index
    %0 = vector.load %arg1[%c0, %c0_0] : memref<5x512xf32, #tpu.memory_space<vmem>>, vector<5x512xf32>
    %1 = math.absf %0 : vector<5x512xf32>
    %2 = vector.shape_cast %1 : vector<5x512xf32> to vector<1x5x512xf32>
    %cst = arith.constant dense<0xFF800000> : vector<1xf32>
    %3 = vector.multi_reduction <maximumf>, %2, %cst [1, 2] : vector<1x5x512xf32> to vector<1xf32>
    %4 = vector.shape_cast %3 : vector<1xf32> to vector<1x1x1xf32>
    %5 = vector.extract %4[0, 0, 0] : f32 from vector<1x1x1xf32>
    %cst_1 = arith.constant 9.99999993E-9 : f32
    %6 = arith.addf %5, %cst_1 : f32
    %cst_2 = arith.constant 1.270000e+02 : f32
    %7 = arith.divf %cst_2, %6 : f32
    %cst_3 = arith.constant 1.270000e+02 : f32
    %8 = arith.divf %6, %cst_3 : f32
    %9 = vector.broadcast %7 : f32 to vector<5x512xf32>
    %10 = arith.mulf %0, %9 : vector<5x512xf32>
    %11 = math.roundeven %10 : vector<5x512xf32>
    %12 = vector.broadcast %8 : f32 to vector<5x512xf32>
    %13 = arith.mulf %11, %12 : vector<5x512xf32>
    %c0_4 = arith.constant 0 : index
    %c0_5 = arith.constant 0 : index
    %14 = vector.load %arg2[%c0_4, %c0_5] : memref<5x512xf32, #tpu.memory_space<vmem>>, vector<5x512xf32>
    tpu.vector_store %arg2[%c0_4, %c0_5], %13 {strides = array<i32>} : memref<5x512xf32, #tpu.memory_space<vmem>>, vector<5x512xf32>,
    return
  }
  func.func @transform_0(%arg0: i32) -> (i32, i32) {
    %c0_i32 = arith.constant 0 : i32
    %c0_i32_0 = arith.constant 0 : i32
    %c0_i32_1 = arith.constant 0 : i32
    return %c0_i32, %c0_i32_0 : i32, i32
  }
  func.func @transform_1(%arg0: i32) -> (i32, i32) {
    %c0_i32 = arith.constant 0 : i32
    %c0_i32_0 = arith.constant 0 : i32
    %c0_i32_1 = arith.constant 0 : i32
    return %c0_i32, %c0_i32_0 : i32, i32
  }
}

</mosaic_0001>

<bundles_post_ra>
// kernel: tpu_custom_call.1
= control target key start
LH: loop header
LB: loop body
LE: loop exit
PB: predicated region body
PF: predicated region fallthrough
CT: control target
= control target key end

     0   :  { %6 = vsyncpa [#allocation3], 0  ;;  %s183_s0 = inlined_call_operand.hbm [shape: f32[5,512], index: 0, kind: input, shape index: {}]   ;;  %s184_s1 = inlined_call_operand.hbm [shape: f32[5,512], index: 1, kind: output, shape index: {}]  }
   0x1   :  { %7 = vsyncpa [#allocation4], 0  ;;  %s147_s6 = smov [#allocation2]   ;;  %s99_s10 = scalar_lea.hbm %s183_s0, 512 }
   0x2   :  { %s14_s7 = sshll.u32 %s147_s6, 4  ;;  %p100_p0 = scmp.ne.s32.totalorder %s183_s0, %s99_s10  ;;  %s15_s7 = int_to_ptr.vmem [resolvable:$true] %s14_s7 }
   0x3   :  { %p103_p1 = scmp.lt.u32.totalorder %s99_s10, %s183_s0 }
   0x5   :  { %p105_p2 = pnand %p103_p1, %p100_p0 }
   0x7   :  { %108 = shalt.err (!%p105_p2)
}
   0x8   :  { %s109_s15 = scalar_lea.vmem %s15_s7, 512  ;;  %p114_p4 = scmp.lt.s32.totalorder %s15_s7, %s15_s7 }
   0x9   :  { %p110_p3 = scmp.ne.s32.totalorder %s15_s7, %s109_s15  ;;  %p115_p5 = scmp.lt.s32.totalorder %s109_s15, %s109_s15 }
   0xb   :  { %p116_p6 = por %p115_p5, %p114_p4 }
   0xd   :  { %p117_p7 = pnand %p116_p6, %p110_p3 }
   0xf   :  { %120 = shalt.err (!%p117_p7)
}
  0x10   :  { %17 = dma.hbm_to_vmem [thread:$0]  %s183_s0, 512, %s15_s7, [#allocation3]  }
  0x11   :  { %143 = dma.done.wait [#allocation3], 512  }
  0x12   :  { %144 = vsyncadd [#allocation3], 4294966784  ;;  %vm29_vm0 = vcmask 1044480   ;;  %v21_v0 = vld [vmem:[#allocation2] sm:$0x1f]  ;;  %s148_s22 = smov [#allocation5]  }
  0x13   :  { %v22_v1 = vld [vmem:[#allocation2 + $0x8] sm:$0x1f]  ;;  %v23_v2 = vld [vmem:[#allocation2 + $0x10] sm:$0x1f]  ;;  %v24_v3 = vld [vmem:[#allocation2 + $0x18] sm:$0x1f] }
  0x14   :  { %v25_v4 = vand.u32 2147483647, %v21_v0  ;;  %v26_v5 = vand.u32 2147483647, %v22_v1  ;;  %v27_v6 = vand.u32 2147483647, %v23_v2 }
  0x15   :  { %v28_v7 = vand.u32 2147483647, %v24_v3  ;;  %s78_s23 = sshll.u32 %s148_s22, 4  ;;  %s79_s23 = int_to_ptr.vmem [resolvable:$true] %s78_s23 }
  0x16   :  { %v30_v8 = vsel %vm29_vm0, %v25_v4, -inf  ;;  %v31_v9 = vsel %vm29_vm0, %v26_v5, -inf  ;;  %v32_v10 = vsel %vm29_vm0, %v27_v6, -inf  ;;  %s121_s24 = scalar_lea.vmem %s79_s23, 512  ;;  %p126_p9 = scmp.lt.s32.totalorder %s79_s23, %s79_s23 }
  0x17   :  { %v33_v11 = vsel %vm29_vm0, %v28_v7, -inf  ;;  %v34_v12 = vmax.f32 %v30_v8, %v31_v9  ;;  %p122_p8 = scmp.ne.s32.totalorder %s79_s23, %s121_s24  ;;  %p127_p10 = scmp.lt.s32.totalorder %s121_s24, %s121_s24 }
  0x18   :  { %v35_v13 = vmax.f32 %v32_v10, %v33_v11 }
  0x19   :  { %p128_p11 = por %p127_p10, %p126_p9 }
  0x1a   :  { %v36_v14 = vmax.f32 %v34_v12, %v35_v13 }
  0x1b   :  { %p129_p12 = pnand %p128_p11, %p122_p8 }
  0x1c   :  { %37 = vmax.xlane.f32.xlu0 %v36_v14 }
  0xa9   :  { %v38_v15 = vpop.xlane.xlu0 %37 }
  0xaa   :  { %v39_v16 = vrot.slane %v38_v15, 4 }
  0xac   :  { %v40_v17 = vmax.f32 %v38_v15, %v39_v16 }
  0xae   :  { %v41_v18 = vrot.slane %v40_v17, 2 }
  0xb0   :  { %v42_v19 = vmax.f32 %v40_v17, %v41_v18 }
  0xb2   :  { %v43_v20 = vrot.slane %v42_v19, 1 }
  0xb4   :  { %v44_v21 = vmax.f32 %v42_v19, %v43_v20 }
  0xb6   :  { %87 = vpush %v44_v21 }
  0xe7   :  { %s88_s0 = spop %87 }
  0xe8   :  { %s46_s18 = sadd.f32 1e-08, %s88_s0 }
  0xea   :  { %v47_v22 = vstv %s46_s18  ;;  %s53_s21 = smul.f32 0.007874016, %s46_s18 }
  0xeb   :  { %97 = vrcp.f32 %v47_v22 }
  0xec   :  { %v63_v33 = vstv %s53_s21 }
  0xf5   :  { %v98_v23 = vpop.eup %97 }
  0xf6   :  { %89 = vpush %v98_v23 }
 0x127   :  { %s90_s19 = spop %89 }
 0x128   :  { %s50_s20 = smul.f32 127.0, %s90_s19 }
 0x12a   :  { %v54_v24 = vstv %s50_s20 }
 0x12b   :  { %v55_v25 = vmul.f32 %v54_v24, %v21_v0  ;;  %v56_v26 = vmul.f32 %v54_v24, %v22_v1  ;;  %v57_v27 = vmul.f32 %v54_v24, %v23_v2  ;;  %v58_v28 = vmul.f32 %v54_v24, %v24_v3 }
 0x12d   :  { %v91_v29 = vround.rtne.f32 %v55_v25  ;;  %v92_v30 = vround.rtne.f32 %v56_v26  ;;  %v93_v31 = vround.rtne.f32 %v57_v27  ;;  %v94_v32 = vround.rtne.f32 %v58_v28 }
 0x12f   :  { %v64_v34 = vmul.f32 %v91_v29, %v63_v33  ;;  %v65_v35 = vmul.f32 %v92_v30, %v63_v33  ;;  %v66_v36 = vmul.f32 %v93_v31, %v63_v33  ;;  %v67_v37 = vmul.f32 %v94_v32, %v63_v33 }
 0x131   :  { %68 = vst [vmem:[#allocation5] sm:$0x1f] %v64_v34  ;;  %69 = vst [vmem:[#allocation5 + $0x8] sm:$0x1f] %v65_v35 }
 0x132   :  { %70 = vst [vmem:[#allocation5 + $0x10] sm:$0x1f] %v66_v36  ;;  %71 = vst [vmem:[#allocation5 + $0x18] sm:$0x1f] %v67_v37 }
 0x133   :  { %132 = shalt.err (!%p129_p12)
}
 0x134   :  { %s133_s27 = scalar_lea.hbm %s184_s1, 512 }
 0x135   :  { %p134_p13 = scmp.ne.s32.totalorder %s184_s1, %s133_s27  ;;  %p137_p0 = scmp.lt.u32.totalorder %s133_s27, %s184_s1 }
 0x137   :  { %p139_p1 = pnand %p137_p0, %p134_p13 }
 0x139   :  { %142 = shalt.err (!%p139_p1)
}
 0x13a   :  { %81 = dma.vmem_to_hbm [thread:$0]  %s79_s23, 512, %s184_s1, [#allocation4]  }
 0x13b   :  { %145 = dma.done.wait [#allocation4], 512  }
 0x13c   :  { %146 = vsyncadd [#allocation4], 4294966784 }
 0x13d   :  { %85 = vsyncpa [#allocation3], 1 }
 0x13e   :  { %86 = vsyncpa [#allocation4], 1 }

</bundles_post_ra>
